<compile_context>
chip_gen: v7x
topology: tpu7x:2x2x1
jax: 0.10.0
libtpu: 0.0.40
codegen_flags: <defaults>
</compile_context>

<pallas_src>
import jax
import jax.numpy as jnp
from jax.experimental import pallas as pl
from jax.experimental.pallas import tpu as pltpu


def _round_up(x, m):
    return (x + m - 1) // m * m


def _conv_matmul_kernel(w_ref, p_ref, o_ref):
    """One MXU matmul per column tile: (m_pad, k_pad) @ (k_pad, tile_cols)."""
    o_ref[...] = jnp.dot(
        w_ref[...], p_ref[...], preferred_element_type=jnp.float32
    ).astype(o_ref.dtype)


def conv2d_pallas(x, w, *, col_tile=512):
    """x: (N, Cin, H, W) float32; w: (Cout, Cin, K, K) float32.

    Valid padding, stride 1, no bias (matches nn.Conv2d(3, 3, 3, padding=0,
    bias=False)). Returns (N, Cout, H-K+1, W-K+1).
    """
    n, cin, h, wdim = x.shape
    cout, cin_w, k, k2 = w.shape
    assert cin == cin_w and k == k2
    ho, wo = h - k + 1, wdim - k + 1
    kk = cin * k * k
    ncols = n * ho * wo

    # ---- im2col (wrapper-side layout plumbing; the MAC stays in-kernel) ----
    # patches[ic*k*k + kh*k + kw, b*ho*wo + i*wo + j] = x[b, ic, i+kh, j+kw]
    planes = [x[:, :, kh:kh + ho, kw:kw + wo] for kh in range(k) for kw in range(k)]
    patches = jnp.stack(planes, axis=2)                       # (n, cin, k*k, ho, wo)
    patches = patches.reshape(n, kk, ho * wo)                  # (n, cin*k*k, ho*wo)
    patches = jnp.transpose(patches, (1, 0, 2)).reshape(kk, ncols)
    patches = patches.astype(jnp.float32)

    w2d = w.reshape(cout, kk).astype(jnp.float32)               # (cout, cin*k*k)

    # ---- pad to vreg/MXU-friendly tiles (small, fusable jnp.pad ops) ----
    m_pad = _round_up(cout, 8)          # sublane multiple for the output rows
    k_pad = _round_up(kk, 8)            # sublane-aligned contraction (27 -> 32)
    col_tile = max(128, _round_up(col_tile, 128))   # keep lane-dense blocks legal
    tile_cols = min(col_tile, _round_up(ncols, 128))
    n_pad = _round_up(ncols, tile_cols)  # lane-dense output columns

    w_p = jnp.pad(w2d, ((0, m_pad - cout), (0, k_pad - kk)))
    p_p = jnp.pad(patches, ((0, k_pad - kk), (0, n_pad - ncols)))

    grid = (n_pad // tile_cols,)

    out2d = pl.pallas_call(
        _conv_matmul_kernel,
        out_shape=jax.ShapeDtypeStruct((m_pad, n_pad), jnp.float32),
        grid=grid,
        in_specs=[
            # Small weight tile resident in VMEM (same block every step).
            # Block == full array dims (8, 32), so the 32-wide last dim is legal.
            pl.BlockSpec((m_pad, k_pad), lambda j: (0, 0)),
            # One lane-dense column tile of the patches matrix per step.
            pl.BlockSpec((k_pad, tile_cols), lambda j: (0, j)),
        ],
        out_specs=pl.BlockSpec((m_pad, tile_cols), lambda j: (0, j)),
        compiler_params=pltpu.CompilerParams(
            # Column tiles are independent.  At this shape the grid has a
            # single step (fewest fixed-overhead steps wins); with larger
            # batches/images the steps shard across v7x's 2 TensorCores.
            dimension_semantics=("parallel",),
        ),
    )(w_p, p_p)

    out = out2d[:cout, :ncols].reshape(cout, n, ho, wo)
    return jnp.transpose(out, (1, 0, 2, 3)).astype(x.dtype)


if __name__ == "__main__":
    key = jax.random.PRNGKey(0)
    kx, kw = jax.random.split(key)

    # Shapes implied by the module: Conv2d(3, 3, 3) -> Cin = Cout = 3, K = 3.
    N, CIN, H, W = 2, 3, 16, 16
    COUT, K = 3, 3

    x = jax.random.normal(kx, (N, CIN, H, W), dtype=jnp.float32)

    # Deterministic weight init mimicking PyTorch's uniform(-1/sqrt(fan_in), +).
    fan_in = CIN * K * K
    bound = 1.0 / (fan_in ** 0.5)
    w = jax.random.uniform(
        kw, (COUT, CIN, K, K), dtype=jnp.float32, minval=-bound, maxval=bound
    )

    out = conv2d_pallas(x, w)
    out = jax.block_until_ready(out)

    # Correctness check against plain-JAX convolution (NCHW / OIHW, valid padding).
    ref = jax.lax.conv_general_dilated(
        x, w, window_strides=(1, 1), padding="VALID",
        dimension_numbers=("NCHW", "OIHW", "NCHW"),
    )
    assert out.shape == (N, COUT, H - K + 1, W - K + 1)
    assert jnp.allclose(out, ref, atol=1e-5, rtol=1e-5)

    print("KERNEL_OK")
</pallas_src>

<mosaic_0001>
module attributes {stable_mosaic.version = 11 : i64} {
  func.func @_conv_matmul_kernel(%arg0: i32, %arg1: memref<8x32xf32, #tpu.memory_space<vmem>>, %arg2: memref<32x512xf32, #tpu.memory_space<vmem>>, %arg3: memref<8x512xf32, #tpu.memory_space<vmem>>) attributes {dimension_semantics = [#tpu.dimension_semantics<parallel>], iteration_bounds = array<i64: 1>, scalar_prefetch = 0 : i64, scratch_operands = 0 : i64, tpu.core_type = #tpu.core_type<tc>, window_params = [{pipeline_mode = #tpu.pipeline_mode<synchronous>, transform_indices = @transform_0, window_bounds = array<i64: 8, 32>}, {transform_indices = @transform_1, window_bounds = array<i64: 32, 512>}, {transform_indices = @transform_2, window_bounds = array<i64: 8, 512>}]} {
    %c0 = arith.constant 0 : index
    %c0_0 = arith.constant 0 : index
    %0 = vector.load %arg1[%c0, %c0_0] : memref<8x32xf32, #tpu.memory_space<vmem>>, vector<8x32xf32>
    %c0_1 = arith.constant 0 : index
    %c0_2 = arith.constant 0 : index
    %1 = vector.load %arg2[%c0_1, %c0_2] : memref<32x512xf32, #tpu.memory_space<vmem>>, vector<32x512xf32>
    %cst = arith.constant dense<0.000000e+00> : vector<8x512xf32>
    %2 = tpu.matmul %0, %1, %cst {dimension_numbers = #tpu.dot_dimension_numbers<[1], [0], [0], [1], [0, 0, 1, 1], [], []>} : vector<8x32xf32>, vector<32x512xf32>, vector<8x512xf32> -> vector<8x512xf32>
    %c0_3 = arith.constant 0 : index
    %c0_4 = arith.constant 0 : index
    %3 = vector.load %arg3[%c0_3, %c0_4] : memref<8x512xf32, #tpu.memory_space<vmem>>, vector<8x512xf32>
    tpu.vector_store %arg3[%c0_3, %c0_4], %2 {strides = array<i32>} : memref<8x512xf32, #tpu.memory_space<vmem>>, vector<8x512xf32>,
    return
  }
  func.func @transform_0(%arg0: i32) -> (i32, i32) {
    %c0_i32 = arith.constant 0 : i32
    %c0_i32_0 = arith.constant 0 : i32
    %c0_i32_1 = arith.constant 0 : i32
    return %c0_i32, %c0_i32_0 : i32, i32
  }
  func.func @transform_1(%arg0: i32) -> (i32, i32) {
    %c0_i32 = arith.constant 0 : i32
    %c0_i32_0 = arith.constant 0 : i32
    return %c0_i32, %arg0 : i32, i32
  }
  func.func @transform_2(%arg0: i32) -> (i32, i32) {
    %c0_i32 = arith.constant 0 : i32
    %c0_i32_0 = arith.constant 0 : i32
    return %c0_i32, %arg0 : i32, i32
  }
}

</mosaic_0001>

<bundles_post_ra>
// kernel: tpu_custom_call.1
= control target key start
LH: loop header
LB: loop body
LE: loop exit
PB: predicated region body
PF: predicated region fallthrough
CT: control target
= control target key end

     0   :  { %7 = vsyncpa [#allocation3], 0  ;;  %s381_s0 = inlined_call_operand.hbm [shape: f32[8,32], index: 0, kind: input, shape index: {}]   ;;  %s382_s1 = inlined_call_operand.hbm [shape: f32[32,512], index: 1, kind: input, shape index: {}]   ;;  %s383_s2 = inlined_call_operand.hbm [shape: f32[8,512], index: 2, kind: output, shape index: {}]  }
   0x1   :  { %8 = vsyncpa [#allocation6], 0 }
   0x2   :  { %9 = vsyncpa [#allocation4], 0  ;;  %s317_s9 = smov [#allocation2]   ;;  %s318_s11 = smov [#allocation5]  }
   0x3   :  { %s16_s10 = sshll.u32 %s317_s9, 4  ;;  %s25_s12 = sshll.u32 %s318_s11, 4  ;;  %s17_s10 = int_to_ptr.vmem [resolvable:$true] %s16_s10  ;;  %s338_s12 = int_to_ptr.vmem [resolvable:$true] %s25_s12 }
   0x4   :  { %s245_s15 = scalar_lea.hbm %s381_s0, 128 }
   0x5   :  { %p246_p0 = scmp.ne.s32.totalorder %s381_s0, %s245_s15  ;;  %p249_p1 = scmp.lt.u32.totalorder %s245_s15, %s381_s0 }
   0x7   :  { %p251_p2 = pnand %p249_p1, %p246_p0 }
   0x9   :  { %254 = shalt.err (!%p251_p2)
}
   0xa   :  { %s255_s20 = scalar_lea.vmem %s17_s10, 128  ;;  %p260_p4 = scmp.lt.s32.totalorder %s17_s10, %s17_s10 }
   0xb   :  { %p256_p3 = scmp.ne.s32.totalorder %s17_s10, %s255_s20  ;;  %p261_p5 = scmp.lt.s32.totalorder %s255_s20, %s255_s20 }
   0xd   :  { %p262_p6 = por %p261_p5, %p260_p4 }
   0xf   :  { %p263_p7 = pnand %p262_p6, %p256_p3 }
  0x11   :  { %266 = shalt.err (!%p263_p7)
}
  0x12   :  { %19 = dma.hbm_to_vmem [thread:$0]  %s381_s0, 128, %s17_s10, [#allocation3]  }
  0x13   :  { %s267_s25 = scalar_lea.hbm %s382_s1, 2048 }
  0x14   :  { %p268_p8 = scmp.ne.s32.totalorder %s382_s1, %s267_s25  ;;  %p271_p9 = scmp.lt.u32.totalorder %s267_s25, %s382_s1 }
  0x16   :  { %p273_p10 = pnand %p271_p9, %p268_p8 }
  0x18   :  { %276 = shalt.err (!%p273_p10)
}
  0x19   :  { %s277_s30 = scalar_lea.vmem %s338_s12, 2048  ;;  %p282_p12 = scmp.lt.s32.totalorder %s338_s12, %s338_s12 }
  0x1a   :  { %p278_p11 = scmp.ne.s32.totalorder %s338_s12, %s277_s30  ;;  %p283_p13 = scmp.lt.s32.totalorder %s277_s30, %s277_s30 }
  0x1c   :  { %p284_p0 = por %p283_p13, %p282_p12 }
  0x1e   :  { %p285_p1 = pnand %p284_p0, %p278_p11 }
  0x20   :  { %288 = shalt.err (!%p285_p1)
}
  0x21   :  { %s319_s0 = smov 512   ;;  %s320_s3 = smov 32  }
  0x22   :  { %31 = dma.hbm_to_vmem [thread:$0]  %s382_s1, 2048, %s338_s12, [#allocation6], %s319_s0, %s319_s0, %s320_s3  }
  0x23   :  { %311 = dma.done.wait [#allocation3], 128  }
  0x24   :  { %312 = vsyncadd [#allocation3], 4294967168 }
  0x25   :  { %313 = dma.done.wait [#allocation6], 2048  }
  0x26   :  { %314 = vsyncadd [#allocation6], 4294965248  ;;  %v321_v0 = vmov 0.0   ;;  %v40_v1 = vld [vmem:[#allocation5 + $0x8] sm:$0xff]  ;;  %v42_v3 = vld [vmem:[#allocation5 + $0x18] sm:$0xff]  ;;  %vm55_vm0 = vcmask 261120  }
  0x27   :  { %123 = vmatprep.mubr.f32.mxu0 %v321_v0  ;;  %194 = vmatprep.mubr.f32.mxu1 %v321_v0  ;;  %v44_v2 = vld [vmem:[#allocation5 + $0x28] sm:$0xff]  ;;  %v46_v5 = vld [vmem:[#allocation5 + $0x38] sm:$0xff]  ;;  %v39_v6 = vld [vmem:[#allocation5] sm:$0xff]  ;;  %s322_s1 = smov [#allocation7]  }
  0x28   :  { %v223_v4 = vpack.c.bf16 %v44_v2, %v40_v1  ;;  %v43_v7 = vld [vmem:[#allocation5 + $0x20] sm:$0xff]  ;;  %v231_v8 = vpack.c.bf16 %v46_v5, %v42_v3  ;;  %v41_v10 = vld [vmem:[#allocation5 + $0x10] sm:$0xff]  ;;  %v48_v12 = vld [vmem:[#allocation5 + $0x48] sm:$0xff]  ;;  %s211_s6 = sshll.u32 %s322_s1, 4  ;;  %s212_s6 = int_to_ptr.vmem [resolvable:$true] %s211_s6 }
  0x29   :  { %v225_v9 = vpack.c.bf16 %v43_v7, %v39_v6  ;;  %v45_v11 = vld [vmem:[#allocation5 + $0x30] sm:$0xff]  ;;  %v52_v14 = vld [vmem:[#allocation5 + $0x68] sm:$0xff]  ;;  %v50_v15 = vld [vmem:[#allocation5 + $0x58] sm:$0xff]  ;;  %s289_s7 = scalar_lea.vmem %s212_s6, 512  ;;  %p294_p3 = scmp.lt.s32.totalorder %s212_s6, %s212_s6 }
  0x2a   :  { %224 = vmatprep.subr.bf16.mxu0 %v223_v4  ;;  %v233_v13 = vpack.c.bf16 %v45_v11, %v41_v10  ;;  %v54_v16 = vld [vmem:[#allocation5 + $0x78] sm:$0xff]  ;;  %232 = vmatprep.subr.bf16.mxu1 %v231_v8  ;;  %v227_v17 = vpack.c.bf16 %v52_v14, %v48_v12  ;;  %v47_v19 = vld [vmem:[#allocation5 + $0x40] sm:$0xff]  ;;  %v49_v21 = vld [vmem:[#allocation5 + $0x50] sm:$0xff]  ;;  %p290_p2 = scmp.ne.s32.totalorder %s212_s6, %s289_s7  ;;  %p295_p4 = scmp.lt.s32.totalorder %s289_s7, %s289_s7 }
  0x2b   :  { %226 = vmatpush1.bf16.msra.mxu0 %v225_v9  ;;  %v235_v18 = vpack.c.bf16 %v54_v16, %v50_v15  ;;  %v51_v20 = vld [vmem:[#allocation5 + $0x60] sm:$0xff]  ;;  %v53_v23 = vld [vmem:[#allocation5 + $0x70] sm:$0xff]  ;;  %v38_v25 = vld [vmem:[#allocation2] sm:$0xff] }
  0x2c   :  { %234 = vmatpush1.bf16.msra.mxu1 %v233_v13  ;;  %v229_v22 = vpack.c.bf16 %v51_v20, %v47_v19  ;;  %228 = vmatprep.subr.bf16.mxu0 %v227_v17  ;;  %v237_v24 = vpack.c.bf16 %v53_v23, %v49_v21  ;;  %p296_p5 = por %p295_p4, %p294_p3 }
  0x2d   :  { %236 = vmatprep.subr.bf16.mxu1 %v235_v18 }
  0x2e   :  { %p297_p6 = pnand %p296_p5, %p290_p2 }
  0x2f   :  { %230 = vmatpush1.bf16.msra.mxu0 %v229_v22 }
  0x30   :  { %238 = vmatpush1.bf16.msra.mxu1 %v237_v24 }
  0x32   :  { %221 = vmatmul.mubr.msk.f32.vlgmr.msra.gmra.mrb[0].mxu0 %vm55_vm0, %v38_v25 }
  0x33   :  { %222 = vmatmul.mubr.msk.f32.vlgmr.msra.gmra.mrb[0].mxu1 %vm55_vm0, %v38_v25 }
 0x105   :  { %v125_v26 = vpop.f32.mrb[0].mxu0 }
 0x106   :  { %201 = vst [vmem:[#allocation7] sm:$0xff] %v125_v26  ;;  %v196_v27 = vpop.f32.mrb[0].mxu1  ;;  %v127_v28 = vpop.f32.mrb[1].mxu0 }
 0x107   :  { %203 = vst [vmem:[#allocation7 + $0x10] sm:$0xff] %v196_v27  ;;  %202 = vst [vmem:[#allocation7 + $0x8] sm:$0xff] %v127_v28  ;;  %v198_v29 = vpop.f32.mrb[1].mxu1 }
 0x108   :  { %204 = vst [vmem:[#allocation7 + $0x18] sm:$0xff] %v198_v29 }
 0x109   :  { %300 = shalt.err (!%p297_p6)
}
 0x10a   :  { %s301_s10 = scalar_lea.hbm %s383_s2, 512 }
 0x10b   :  { %p302_p7 = scmp.ne.s32.totalorder %s383_s2, %s301_s10  ;;  %p305_p8 = scmp.lt.u32.totalorder %s301_s10, %s383_s2 }
 0x10d   :  { %p307_p9 = pnand %p305_p8, %p302_p7 }
 0x10f   :  { %310 = shalt.err (!%p307_p9)
}
 0x110   :  { %214 = dma.vmem_to_hbm [thread:$0]  %s212_s6, 512, %s383_s2, [#allocation4]  }
 0x111   :  { %315 = dma.done.wait [#allocation4], 512  }
 0x112   :  { %316 = vsyncadd [#allocation4], 4294966784 }
 0x113   :  { %218 = vsyncpa [#allocation3], 1 }
 0x114   :  { %219 = vsyncpa [#allocation6], 1 }
 0x115   :  { %220 = vsyncpa [#allocation4], 1 }

</bundles_post_ra>
